<compile_context>
chip_gen: v7x
topology: tpu7x:2x2x1
jax: 0.10.0
libtpu: 0.0.40
codegen_flags: <defaults>
</compile_context>

<pallas_src>
import functools

import jax
import jax.numpy as jnp
from jax.experimental import pallas as pl
from jax.experimental.pallas import tpu as pltpu


def _cbr_kernel(w_ref, shift_ref, p_ref, o_ref):
    # w_ref:     (F_pad, K_pad)   im2col conv weights with BN scale folded in
    # shift_ref: (F_pad, 1)       f32: bias*scale + (beta - mean*scale)
    # p_ref:     (1, K_pad, TM)   transposed patch tile for one image
    # o_ref:     (1, F_pad, TM)
    acc = jnp.dot(w_ref[...], p_ref[0], preferred_element_type=jnp.float32)
    acc = acc + shift_ref[...]                      # lane-broadcast add (f32)
    o_ref[0] = jnp.maximum(acc, 0.0).astype(o_ref.dtype)


def _im2col_t(x, k, stride, padding, dilation):
    # x: (N, C, H, W) -> per-image transposed patches (N, C*k*k, Ho*Wo).
    # K ordering is (c, kh, kw), matching PyTorch weight.reshape(F, C*k*k).
    N, C, H, W = x.shape
    xp = jnp.pad(x, ((0, 0), (0, 0), (padding, padding), (padding, padding)))
    eff_k = dilation * (k - 1) + 1
    Ho = (H + 2 * padding - eff_k) // stride + 1
    Wo = (W + 2 * padding - eff_k) // stride + 1
    cols = []
    for kh in range(k):
        for kw in range(k):
            i0 = kh * dilation
            j0 = kw * dilation
            cols.append(
                xp[:, :, i0:i0 + stride * Ho:stride, j0:j0 + stride * Wo:stride])
    patches = jnp.stack(cols, axis=0)                   # (k*k, N, C, Ho, Wo)
    patches = patches.transpose(1, 2, 0, 3, 4)          # (N, C, k*k, Ho, Wo)
    patches = patches.reshape(N, C * k * k, Ho * Wo)    # (N, K, M)
    return patches, Ho, Wo


def _pick_tm(m_per, n_batch, k_pad, f_pad, in_bytes):
    # VMEM working set (double-buffered patch + output tiles, resident
    # weights/shift, default double-buffered) must fit a conservative budget
    # that works on v7x (64 MiB physical) as well as v5e/v6e (128 MiB).
    budget = 40 * 1024 * 1024
    resident = 2 * in_bytes * f_pad * k_pad + 2 * 4 * f_pad
    m_ceil = max(128, pl.cdiv(m_per, 128) * 128)
    tm = 128
    while (tm * 2 <= m_ceil
           and 2 * (in_bytes * k_pad + 4 * f_pad) * (tm * 2) + resident <= budget):
        tm *= 2
    # Prefer >= 8 total grid steps (>= 4 per v7x TensorCore) so the pipeline
    # overlaps DMA with compute; per-step overhead is only ~0.35 us.
    while tm > 128 and n_batch * pl.cdiv(m_per, tm) < 8:
        tm //= 2
    return tm


@functools.partial(jax.jit,
                   static_argnames=("k_size", "stride", "padding", "dilation",
                                    "with_bn", "compute_dtype"))
def conv2d_bn_relu(x, weight, bias, gamma, beta, running_mean, running_var, *,
                   k_size, stride, padding, dilation=1, eps=1e-5,
                   with_bn=True, compute_dtype=jnp.bfloat16):
    # x:      (N, C_in, H, W)   NCHW (PyTorch convention)
    # weight: (C_out, C_in, k, k)
    N, C, H, W = x.shape
    F = weight.shape[0]
    K = C * k_size * k_size

    patches, Ho, Wo = _im2col_t(x, k_size, stride, padding, dilation)  # (N,K,M)
    m_per = Ho * Wo

    # ---- fold conv bias + BatchNorm (inference / running stats) in f32 -----
    # TODO(synk): training-mode batch statistics would need an extra global
    # reduction pass; eval-mode (running stats) semantics are implemented.
    w_col = weight.reshape(F, K).astype(jnp.float32)
    if with_bn:
        scale = gamma.astype(jnp.float32) / jnp.sqrt(
            running_var.astype(jnp.float32) + eps)
        shift = beta.astype(jnp.float32) - running_mean.astype(jnp.float32) * scale
    else:
        scale = jnp.ones((F,), jnp.float32)
        shift = jnp.zeros((F,), jnp.float32)
    w_fused = w_col * scale[:, None]                                  # (F, K)
    shift_fused = (bias.astype(jnp.float32) * scale + shift).reshape(F, 1)

    # ---- minimal padding: sublane packing only (no 128-padding of K or F) --
    in_bytes = jnp.dtype(compute_dtype).itemsize
    pack = 8 * (4 // in_bytes)            # 8 for f32, 16 for bf16
    K_pad = pl.cdiv(K, pack) * pack
    F_pad = pl.cdiv(F, 8) * 8

    tm = _pick_tm(m_per, N, K_pad, F_pad, in_bytes)
    M_pad = pl.cdiv(m_per, tm) * tm

    patches = jnp.pad(patches.astype(compute_dtype),
                      ((0, 0), (0, K_pad - K), (0, M_pad - m_per)))
    w_fused = jnp.pad(w_fused, ((0, F_pad - F), (0, K_pad - K))).astype(compute_dtype)
    shift_fused = jnp.pad(shift_fused, ((0, F_pad - F), (0, 0)))      # stays f32

    grid = (N, M_pad // tm)

    working = (2 * in_bytes * K_pad * tm + 2 * 4 * F_pad * tm
               + 2 * in_bytes * F_pad * K_pad + 2 * 4 * F_pad)
    vmem_limit = min(56 * 1024 * 1024, max(32 * 1024 * 1024, 2 * working))

    out = pl.pallas_call(
        _cbr_kernel,
        out_shape=jax.ShapeDtypeStruct((N, F_pad, M_pad), x.dtype),
        grid_spec=pltpu.PrefetchScalarGridSpec(
            num_scalar_prefetch=0,
            grid=grid,
            in_specs=[
                pl.BlockSpec((F_pad, K_pad), lambda n, m: (0, 0)),     # weights
                pl.BlockSpec((F_pad, 1), lambda n, m: (0, 0)),         # shift
                pl.BlockSpec((1, K_pad, tm), lambda n, m: (n, 0, m)),  # patches
            ],
            out_specs=pl.BlockSpec((1, F_pad, tm), lambda n, m: (n, 0, m)),
        ),
        compiler_params=pltpu.CompilerParams(
            dimension_semantics=("parallel", "parallel"),
            vmem_limit_bytes=vmem_limit),
    )(w_fused, shift_fused, patches)

    if F_pad != F or M_pad != m_per:
        out = out[:, :F, :m_per]
    # (N, F, Ho*Wo) -> (N, F, Ho, Wo): pure reshape, no data movement.
    return out.reshape(N, F, Ho, Wo)


def _reference(x, weight, bias, gamma, beta, running_mean, running_var,
               *, k_size, stride, padding, dilation=1, eps=1e-5):
    # Pure-JAX reference (f32) for sanity checking.
    out = jax.lax.conv_general_dilated(
        x, weight, window_strides=(stride, stride),
        padding=[(padding, padding), (padding, padding)],
        rhs_dilation=(dilation, dilation),
        dimension_numbers=("NCHW", "OIHW", "NCHW"))
    out = out + bias[None, :, None, None]
    scale = gamma / jnp.sqrt(running_var + eps)
    shift = beta - running_mean * scale
    out = out * scale[None, :, None, None] + shift[None, :, None, None]
    return jnp.maximum(out, 0.0)


if __name__ == "__main__":
    # conv2DBatchNormRelu(in_channels=4, n_filters=8, k_size=3, stride=1,
    #                     padding=1, bias=True, dilation=1, with_bn=True)
    N, C_in, H, W = 2, 4, 16, 16
    C_out, k_size, stride, padding = 8, 3, 1, 1

    key = jax.random.PRNGKey(0)
    kx, kw, kb, kg, kbe, km, kv = jax.random.split(key, 7)

    x = jax.random.normal(kx, (N, C_in, H, W), dtype=jnp.float32)
    weight = jax.random.normal(kw, (C_out, C_in, k_size, k_size),
                               dtype=jnp.float32) * 0.1
    bias = jax.random.normal(kb, (C_out,), dtype=jnp.float32) * 0.1
    gamma = 1.0 + 0.1 * jax.random.normal(kg, (C_out,), dtype=jnp.float32)
    beta = 0.1 * jax.random.normal(kbe, (C_out,), dtype=jnp.float32)
    running_mean = 0.1 * jax.random.normal(km, (C_out,), dtype=jnp.float32)
    running_var = 1.0 + 0.1 * jax.random.uniform(kv, (C_out,), dtype=jnp.float32)

    ref = _reference(x, weight, bias, gamma, beta, running_mean, running_var,
                     k_size=k_size, stride=stride, padding=padding)

    # Exact-precision path (f32 streaming) -> tight tolerance.
    out_f32 = conv2d_bn_relu(x, weight, bias, gamma, beta, running_mean,
                             running_var, k_size=k_size, stride=stride,
                             padding=padding, compute_dtype=jnp.float32)
    out_f32 = jax.block_until_ready(out_f32)
    assert out_f32.shape == (N, C_out, H, W), out_f32.shape
    assert jnp.allclose(out_f32, ref, atol=1e-4, rtol=1e-4), float(
        jnp.max(jnp.abs(out_f32 - ref)))

    # Default fast path (bf16-streamed operands, f32 accumulate/epilogue).
    out_bf16 = conv2d_bn_relu(x, weight, bias, gamma, beta, running_mean,
                              running_var, k_size=k_size, stride=stride,
                              padding=padding)
    out_bf16 = jax.block_until_ready(out_bf16)
    assert out_bf16.shape == (N, C_out, H, W), out_bf16.shape
    assert jnp.allclose(out_bf16, ref, atol=5e-2, rtol=5e-2), float(
        jnp.max(jnp.abs(out_bf16 - ref)))

    print("KERNEL_OK")
</pallas_src>

<mosaic_0001>
module attributes {stable_mosaic.version = 11 : i64} {
  func.func @_cbr_kernel(%arg0: i32, %arg1: i32, %arg2: memref<8x40xf32, #tpu.memory_space<vmem>>, %arg3: memref<8x1xf32, #tpu.memory_space<vmem>>, %arg4: memref<1x40x128xf32, #tpu.memory_space<vmem>>, %arg5: memref<1x8x128xf32, #tpu.memory_space<vmem>>) attributes {dimension_semantics = [#tpu.dimension_semantics<parallel>, #tpu.dimension_semantics<parallel>], iteration_bounds = array<i64: 2, 2>, scalar_prefetch = 0 : i64, scratch_operands = 0 : i64, tpu.core_type = #tpu.core_type<tc>, window_params = [{pipeline_mode = #tpu.pipeline_mode<synchronous>, transform_indices = @transform_0, window_bounds = array<i64: 8, 40>}, {pipeline_mode = #tpu.pipeline_mode<synchronous>, transform_indices = @transform_1, window_bounds = array<i64: 8, 1>}, {transform_indices = @transform_2, window_bounds = array<i64: 1, 40, 128>}, {transform_indices = @transform_3, window_bounds = array<i64: 1, 8, 128>}]} {
    %c0 = arith.constant 0 : index
    %c0_0 = arith.constant 0 : index
    %0 = vector.load %arg2[%c0, %c0_0] : memref<8x40xf32, #tpu.memory_space<vmem>>, vector<8x40xf32>
    %c0_1 = arith.constant 0 : index
    %c0_2 = arith.constant 0 : index
    %c0_3 = arith.constant 0 : index
    %1 = vector.load %arg4[%c0_1, %c0_2, %c0_3] : memref<1x40x128xf32, #tpu.memory_space<vmem>>, vector<1x40x128xf32>
    %2 = vector.shape_cast %1 : vector<1x40x128xf32> to vector<40x128xf32>
    %cst = arith.constant dense<0.000000e+00> : vector<8x128xf32>
    %3 = tpu.matmul %0, %2, %cst {dimension_numbers = #tpu.dot_dimension_numbers<[1], [0], [0], [1], [0, 0, 1, 1], [], []>} : vector<8x40xf32>, vector<40x128xf32>, vector<8x128xf32> -> vector<8x128xf32>
    %c0_4 = arith.constant 0 : index
    %c0_5 = arith.constant 0 : index
    %4 = vector.load %arg3[%c0_4, %c0_5] : memref<8x1xf32, #tpu.memory_space<vmem>>, vector<8x1xf32>
    %5 = vector.broadcast %4 : vector<8x1xf32> to vector<8x128xf32>
    %6 = arith.addf %3, %5 : vector<8x128xf32>
    %cst_6 = arith.constant 0.000000e+00 : f32
    %7 = vector.broadcast %cst_6 : f32 to vector<8x128xf32>
    %8 = arith.maximumf %6, %7 : vector<8x128xf32>
    %c0_7 = arith.constant 0 : index
    %c0_8 = arith.constant 0 : index
    %c0_9 = arith.constant 0 : index
    %9 = vector.load %arg5[%c0_7, %c0_8, %c0_9] : memref<1x8x128xf32, #tpu.memory_space<vmem>>, vector<1x8x128xf32>
    %10 = vector.shape_cast %9 : vector<1x8x128xf32> to vector<8x128xf32>
    %11 = vector.shape_cast %8 : vector<8x128xf32> to vector<1x8x128xf32>
    tpu.vector_store %arg5[%c0_7, %c0_8, %c0_9], %11 {strides = array<i32>} : memref<1x8x128xf32, #tpu.memory_space<vmem>>, vector<1x8x128xf32>,
    return
  }
  func.func @transform_0(%arg0: i32, %arg1: i32) -> (i32, i32) {
    %c0_i32 = arith.constant 0 : i32
    %c0_i32_0 = arith.constant 0 : i32
    %c0_i32_1 = arith.constant 0 : i32
    return %c0_i32, %c0_i32_0 : i32, i32
  }
  func.func @transform_1(%arg0: i32, %arg1: i32) -> (i32, i32) {
    %c0_i32 = arith.constant 0 : i32
    %c0_i32_0 = arith.constant 0 : i32
    %c0_i32_1 = arith.constant 0 : i32
    return %c0_i32, %c0_i32_0 : i32, i32
  }
  func.func @transform_2(%arg0: i32, %arg1: i32) -> (i32, i32, i32) {
    %c0_i32 = arith.constant 0 : i32
    %c0_i32_0 = arith.constant 0 : i32
    return %arg0, %c0_i32, %arg1 : i32, i32, i32
  }
  func.func @transform_3(%arg0: i32, %arg1: i32) -> (i32, i32, i32) {
    %c0_i32 = arith.constant 0 : i32
    %c0_i32_0 = arith.constant 0 : i32
    return %arg0, %c0_i32, %arg1 : i32, i32, i32
  }
}

</mosaic_0001>

<bundles_post_ra>
// kernel: conv2d_bn_relu.1
= control target key start
LH: loop header
LB: loop body
LE: loop exit
PB: predicated region body
PF: predicated region fallthrough
CT: control target
= control target key end

     0   :  { %s601_s12 = smov 0   ;;  %s603_s13 = smov 0   ;;  %s698_s0 = inlined_call_operand.vmem [shape: f32[8,40], index: 0, kind: input, shape index: {}]   ;;  %s699_s1 = inlined_call_operand.vmem [shape: f32[8,1], index: 1, kind: input, shape index: {}]   ;;  %s700_s2 = inlined_call_operand.vmem [shape: f32[2,40,256], index: 2, kind: input, shape index: {}]   ;;  %s701_s3 = inlined_call_operand.vmem [shape: f32[2,8,256], index: 3, kind: output, shape index: {}]  }
   0x1   :  { %s605_s14 = smov 0   ;;  %s607_s15 = smov 0  }
   0x2   :  { %s609_s16 = smov 0   ;;  %s611_s17 = smov 0  }
   0x3   :  { %s613_s18 = smov 0  }
   0x4 LB: > { %s22_s19 = sadd.s32 1, %s567_s16  ;;  %s25_s20 = sadd.s32 1, %s571_s17  ;;  %s575_s18 = sphi %s613_s18, %s13_s18   ;;  %s571_s17 = sphi %s611_s17, %s707_s17   ;;  %s567_s16 = sphi %s609_s16, %s706_s16   ;;  %s563_s15 = sphi %s607_s15, %s705_s15   ;;  %s559_s14 = sphi %s605_s14, %s704_s14   ;;  %s555_s13 = sphi %s603_s13, %s703_s13   ;;  %s551_s12 = sphi %s601_s12, %s702_s12  }
   0x5   : > { %p23_p0 = scmp.ge.s32.totalorder %s22_s19, 2  ;;  %p83_p1 = scmp.ne.s32.totalorder %s555_s13, %s551_s12 }
   0x6   : > { %p84_p2 = scmp.eq.s32.totalorder %s575_s18, 0  ;;  %s76_s24 = sadd.s32 1, %s555_s13 }
   0x7   : > { %s709_s19 = smov (%p23_p0, %s22_s19), 0  ;;  %s711_s20 = smov (!%p23_p0, %s25_s20), %s571_s17 }
   0x8   : > { %p85_p3 = por %p84_p2, %p83_p1  ;;  %p27_p4 = scmp.ge.s32.totalorder %s711_s20, 2 }
   0x9   : > { %s72_s21 = ssub.s32 %s567_s16, %s709_s19  ;;  %p424_p6 = scmp.ge.s32.totalorder %s575_s18, 4 }
   0xa   : > { %s713_s20 = smov (%p27_p4, %s711_s20), 0 }
   0xb   : > { %s71_s22 = ssub.s32 %s571_s17, %s713_s20  ;;  %143 = sbr.rel (%p424_p6) target bundleno = 28 (0x1c), region = 24 }
   0xc   : > { %s73_s23 = sor.u32 %s72_s21, %s71_s22 }
   0xd   : > { %p74_p5 = scmp.eq.s32.totalorder %s73_s23, 0 }
   0xf   : > { %s652_s25 = scalar_select %p74_p5, %s555_s13, %s76_s24  }
  0x12   : > { %146 = sbr.rel (!%p85_p3) target bundleno = 28 (0x1c), region = 28  ;;  %s148_s26 = sand.u32 (%p85_p3), 1, %s555_s13  }
  0x13   : > { %s458_s27 = smul.u32 (%p85_p3), 10, %s571_s17 }
  0x14   : > { %s457_s28 = smul.u32 (%p85_p3), 40, %s148_s26 }
  0x15   : > { %s152_s29 = sadd.s32 (%p85_p3), %s567_s16, %s458_s27 }
  0x16   : > { %s425_s30 = sshll.u32 (%p85_p3), %s152_s29, 3  ;;  %s150_s7 = scalar_lea.vmem (%p85_p3), [#allocation2], %s457_s28 }
  0x17   : > { %s154_s6 = scalar_lea.vmem (%p85_p3), %s700_s2, %s425_s30 }
  0x18   : > { %v190_v0 = vld [vmem:[%s154_s6] sm:$0xff] (%p85_p3)  ;;  %v192_v1 = vld [vmem:[%s154_s6 + $0x10] sm:$0xff] (%p85_p3) }
  0x19   : > { %v194_v2 = vld [vmem:[%s154_s6 + $0x20] sm:$0xff]  ;;  %191 = vst [vmem:[%s150_s7] sm:$0xff] %v190_v0  ;;  %193 = vst [vmem:[%s150_s7 + $0x8] sm:$0xff] %v192_v1  ;;  %v196_v3 = vld [vmem:[%s154_s6 + $0x30] sm:$0xff] }
  0x1a   : > { %195 = vst [vmem:[%s150_s7 + $0x10] sm:$0xff] %v194_v2  ;;  %v198_v4 = vld [vmem:[%s154_s6 + $0x40] sm:$0xff]  ;;  %197 = vst [vmem:[%s150_s7 + $0x18] sm:$0xff] %v196_v3 }
  0x1b   : > { %199 = vst [vmem:[%s150_s7 + $0x20] sm:$0xff] %v198_v4 }
  0x1c PF: > { %p426_p7 = scmp.ge.s32.totalorder %s575_s18, 1  ;;  %p204_p8 = scmp.lt.s32.totalorder %s575_s18, 5 }
  0x1e   : > { %p205_p9 = pnand %p426_p7, %p204_p8 }
  0x1f   : > { %s211_s8 = sand.u32 (!%p205_p9), 1, %s551_s12   ;;  %v577_v5 = vmov (!%p205_p9), 0.0|0.0   ;;  %vm578_vm0 = vmmov (!%p205_p9), 0   ;;  %v579_v6 = vmov (!%p205_p9), 0.0   ;;  %v251_v7 = vld [vmem:[%s699_s1] sm:$0xff] (!%p205_p9)  ;;  %v580_v8 = vmov (!%p205_p9), 0  }
  0x20   : > { %208 = sbr.rel (%p205_p9) target bundleno = 265 (0x109), region = 66  ;;  %451 = vmatprep.subr.bf16.mxu0 (!%p205_p9), %v577_v5  ;;  %448 = vmatprep.mubr.msk.f32.mxu0 (!%p205_p9), %vm578_vm0, %v579_v6  ;;  %v245_v16 = vld [vmem:[%s698_s0] sm:$0xff] (!%p205_p9)  ;;  %vm257_vm1 = vcmask (!%p205_p9), 326656   ;;  %p237_p10 = scmp.lt.s32.totalorder (!%p205_p9), %s563_s15, 1 }
  0x21   : > { %s459_s9 = smul.u32 (!%p205_p9), 40, %s211_s8  ;;  %520 = vset.pattern.permute.xlu0 (!%p205_p9), %v580_v8  ;;  %p239_p11 = scmp.lt.s32.totalorder (!%p205_p9), %s559_s14, 1 }
  0x22   : > { %254 = vperm.xlu0 (!%p205_p9), %520, %v251_v7  }
  0x23   : > { %s213_s21 = scalar_lea.vmem (!%p205_p9), [#allocation2], %s459_s9 }
  0x24   : > { %v246_v9 = vld [vmem:[%s213_s21] sm:$0xff] (!%p205_p9)  ;;  %v247_v10 = vld [vmem:[%s213_s21 + $0x8] sm:$0xff] (!%p205_p9)  ;;  %v248_v11 = vld [vmem:[%s213_s21 + $0x10] sm:$0xff] (!%p205_p9) }
  0x25   : > { %v452_v12 = vpack.c.bf16 (!%p205_p9), %v247_v10, %v246_v9  ;;  %v249_v13 = vld [vmem:[%s213_s21 + $0x18] sm:$0xff] (!%p205_p9)  ;;  %v250_v15 = vld [vmem:[%s213_s21 + $0x20] sm:$0xff] (!%p205_p9) }
  0x26   : > { %v455_v14 = vpack.c.bf16 (!%p205_p9), %v249_v13, %v248_v11 }
  0x27   : > { %453 = vmatpush3.bf16.msra.mxu0 %v452_v12  ;;  %s715_s15 = smov (!%p237_p10, %s563_s15), 1  ;;  %s717_s14 = smov (!%p239_p11, %s559_s14), 1 }
  0x28   : > { %454 = vmatprep.subr.bf16.mxu0 %v577_v5  ;;  %s427_s23 = sshll.u32 %s715_s15, 1 }
  0x29   : > { %s242_s24 = sadd.s32 %s427_s23, %s717_s14 }
  0x2a   : > { %s428_s26 = sshll.u32 %s242_s24, 3 }
  0x2b   : > { %456 = vmatpush3.bf16.msra.mxu0 %v455_v14  ;;  %s244_s29 = scalar_lea.vmem %s701_s3, %s428_s26 }
  0x2c   : > { %446 = vmatprep.subr.mxu0 %v579_v6 }
  0x2f   : > { %447 = vmatpush3.msra.mxu0 %v250_v15 }
  0x30   : > { %449 = vmatmul.mubr.msk.f32.vlgmr.msra.gmra.mrb[0].mxu0 %vm257_vm1, %v245_v16 }
  0xa1   : > { %v255_v17 = vpop.permute.xlu0 %254 }
 0x103   : > { %v327_v18 = vpop.f32.mrb[0].mxu0 }
 0x104   : > { %v328_v19 = vadd.f32 %v327_v18, %v255_v17  ;;  %v450_v20 = vpop.f32.mrb[1].mxu0 }
 0x106   : > { %v331_v21 = vmax.f32 %v328_v19, 0.0 }
 0x108   : > { %332 = vst [vmem:[%s244_s29] sm:$0xff] %v331_v21 }
 0x109 PF: > { %s13_s18 = sadd.s32 1, %s575_s18   ;;  %s702_s12 = smov %s555_s13 }
 0x10a   : > { %p10_p12 = scmp.ge.s32.totalorder %s13_s18, 6   ;;  %s703_s13 = smov %s652_s25 }
 0x10b   : > { %s704_s14 = smov %s567_s16  ;;  %s705_s15 = smov %s571_s17 }
 0x10c   : > { %s706_s16 = smov %s709_s19  ;;  %s707_s17 = smov %s713_s20 }
 0x10d   :  { %12 = sbr.rel (!%p10_p12) target bundleno = 4 (0x4), region = 105 }

</bundles_post_ra>
